<compile_context>
chip_gen: v7x
topology: tpu7x:2x2x1
jax: 0.10.0
libtpu: 0.0.40
codegen_flags: <defaults>
</compile_context>

<pallas_src>
import functools

import jax
import jax.numpy as jnp
from jax import lax
from jax.experimental import pallas as pl
from jax.experimental.pallas import tpu as pltpu


def _round_up(n, m):
    return ((n + m - 1) // m) * m


def _mlp_kernel(x_ref, w1_ref, b1_ref, w2_ref, b2_ref, oT_ref):
    # x_ref : [TB, D] native row-major batch tile (one contiguous DMA burst)
    # w1_ref: [H, D]   b1_ref: [H, 1]   w2_ref: [C, H]   b2_ref: [C, 1]
    # oT_ref: [C, TB]  feature-major output (lane dim = batch -> unmasked stores)

    # fc1: contract D of w1 [H, D] with D of x [TB, D]  ->  [H, TB], f32 MXU accumulation.
    h = lax.dot_general(
        w1_ref[...], x_ref[...],
        dimension_numbers=(((1,), (1,)), ((), ())),
        preferred_element_type=jnp.float32,
    )
    h = jnp.maximum(h + b1_ref[...], 0.0)                 # bias broadcast along lanes + ReLU

    # fc2: [C, H] @ [H, TB] -> [C, TB]
    out = jnp.dot(w2_ref[...], h, preferred_element_type=jnp.float32)
    oT_ref[...] = (out + b2_ref[...]).astype(oT_ref.dtype)


@functools.partial(jax.jit, static_argnames=("block_batch", "use_bf16"))
def time_order_classifier(x, w1, b1, w2, b2, *, block_batch=32768, use_bf16=True):
    """Forward pass of TimeOrderClassifier.

    x : [B, D] float32
    w1: [H, D] (PyTorch nn.Linear layout), b1: [H]
    w2: [C, H],                            b2: [C]
    returns [B, C] float32

    block_batch: batch-tile size (rounded to a multiple of 128).  32768 fits v5e's
      16 MiB scoped-VMEM default; sweep up to ~65536 on v6e/v7x (keep >= 2 grid steps
      on v7x so both TensorCores stream DMAs).
    use_bf16: cast x and w1 to bf16 (f32 accumulation) -- halves the dominant x HBM
      traffic; expect ~1e-2 relative deviation vs. the f32 PyTorch reference.
    """
    B, D = x.shape
    H = w1.shape[0]
    C = w2.shape[0]

    # Batch tile: multiple of 128 (lane width).  No host-side padding of x; the ragged
    # last block (and TB > B for tiny batches) is handled by Pallas masked I/O.
    TB = _round_up(min(block_batch, B), 128)
    grid = (pl.cdiv(B, TB),)

    b1c = b1.reshape(H, 1).astype(jnp.float32)
    b2c = b2.reshape(C, 1).astype(jnp.float32)
    w2c = w2.astype(jnp.float32)

    if use_bf16:
        x_in = x.astype(jnp.bfloat16)
        w1_in = w1.astype(jnp.bfloat16)
    else:
        x_in = x.astype(jnp.float32)
        w1_in = w1.astype(jnp.float32)

    cost = pl.CostEstimate(
        flops=2 * B * (D * H + H * C),
        transcendentals=0,
        bytes_accessed=(x_in.size * x_in.dtype.itemsize          # x stream (dominant)
                        + w1_in.size * w1_in.dtype.itemsize      # weights (resident)
                        + (H + C * H + C) * 4                    # biases + w2
                        + C * B * 4),                            # output
    )

    outT = pl.pallas_call(
        _mlp_kernel,
        out_shape=jax.ShapeDtypeStruct((C, B), jnp.float32),
        grid=grid,
        in_specs=[
            pl.BlockSpec((TB, D), lambda i: (i, 0)),   # x batch tile, native layout (pipelined)
            pl.BlockSpec((H, D), lambda i: (0, 0)),    # fc1 weight, stays VMEM-resident
            pl.BlockSpec((H, 1), lambda i: (0, 0)),    # fc1 bias
            pl.BlockSpec((C, H), lambda i: (0, 0)),    # fc2 weight
            pl.BlockSpec((C, 1), lambda i: (0, 0)),    # fc2 bias
        ],
        out_specs=pl.BlockSpec((C, TB), lambda i: (0, i)),  # feature-major, lane-dense stores
        compiler_params=pltpu.CompilerParams(
            dimension_semantics=("parallel",),         # megacore sharding on v7x
        ),
        cost_estimate=cost,
    )(x_in, w1_in, b1c, w2c, b2c)

    return outT.T                                       # tiny [C, B] -> [B, C] transpose


def init_params(key, input_size, hidden=32, num_classes=2):
    """PyTorch nn.Linear-style init U(-1/sqrt(fan_in), 1/sqrt(fan_in)), PyTorch layouts."""
    k1, k2, k3, k4 = jax.random.split(key, 4)
    bound1 = 1.0 / jnp.sqrt(jnp.float32(input_size))
    bound2 = 1.0 / jnp.sqrt(jnp.float32(hidden))
    w1 = jax.random.uniform(k1, (hidden, input_size), jnp.float32, -bound1, bound1)
    b1 = jax.random.uniform(k2, (hidden,), jnp.float32, -bound1, bound1)
    w2 = jax.random.uniform(k3, (num_classes, hidden), jnp.float32, -bound2, bound2)
    b2 = jax.random.uniform(k4, (num_classes,), jnp.float32, -bound2, bound2)
    return w1, b1, w2, b2


if __name__ == "__main__":
    key = jax.random.PRNGKey(0)
    k_x, k_p = jax.random.split(key)

    batch = 8
    input_size = 16  # small synthetic feature size

    x = jax.random.normal(k_x, (batch, input_size), jnp.float32)
    w1, b1, w2, b2 = init_params(k_p, input_size)

    # Reference (same math as the PyTorch forward): relu(x @ w1.T + b1) @ w2.T + b2
    h_ref = jnp.maximum(
        jnp.dot(x, w1.T, precision=lax.Precision.HIGHEST) + b1, 0.0)
    ref = jnp.dot(h_ref, w2.T, precision=lax.Precision.HIGHEST) + b2

    # Default (bf16 x / w1) inference path.
    out = jax.block_until_ready(time_order_classifier(x, w1, b1, w2, b2))
    assert out.shape == (batch, 2)
    assert jnp.allclose(out, ref, atol=3e-2, rtol=3e-2), \
        float(jnp.max(jnp.abs(out - ref)))

    # Full-f32 path (tighter check of the kernel math).
    out32 = jax.block_until_ready(
        time_order_classifier(x, w1, b1, w2, b2, use_bf16=False))
    assert jnp.allclose(out32, ref, atol=2e-3, rtol=2e-3), \
        float(jnp.max(jnp.abs(out32 - ref)))

    print("KERNEL_OK")
</pallas_src>

<mosaic_0001>
module attributes {stable_mosaic.version = 11 : i64} {
  func.func @_mlp_kernel(%arg0: i32, %arg1: memref<128x16xbf16, #tpu.memory_space<vmem>>, %arg2: memref<32x16xbf16, #tpu.memory_space<vmem>>, %arg3: memref<32x1xf32, #tpu.memory_space<vmem>>, %arg4: memref<2x32xf32, #tpu.memory_space<vmem>>, %arg5: memref<2x1xf32, #tpu.memory_space<vmem>>, %arg6: memref<2x128xf32, #tpu.memory_space<vmem>>) attributes {dimension_semantics = [#tpu.dimension_semantics<parallel>], iteration_bounds = array<i64: 1>, scalar_prefetch = 0 : i64, scratch_operands = 0 : i64, tpu.core_type = #tpu.core_type<tc>, window_params = [{transform_indices = @transform_0, window_bounds = array<i64: 128, 16>}, {pipeline_mode = #tpu.pipeline_mode<synchronous>, transform_indices = @transform_1, window_bounds = array<i64: 32, 16>}, {pipeline_mode = #tpu.pipeline_mode<synchronous>, transform_indices = @transform_2, window_bounds = array<i64: 32, 1>}, {pipeline_mode = #tpu.pipeline_mode<synchronous>, transform_indices = @transform_3, window_bounds = array<i64: 2, 32>}, {pipeline_mode = #tpu.pipeline_mode<synchronous>, transform_indices = @transform_4, window_bounds = array<i64: 2, 1>}, {transform_indices = @transform_5, window_bounds = array<i64: 2, 128>}]} {
    %c0 = arith.constant 0 : index
    %c0_0 = arith.constant 0 : index
    %0 = vector.load %arg2[%c0, %c0_0] : memref<32x16xbf16, #tpu.memory_space<vmem>>, vector<32x16xbf16>
    %c0_1 = arith.constant 0 : index
    %c0_2 = arith.constant 0 : index
    %1 = vector.load %arg1[%c0_1, %c0_2] : memref<128x16xbf16, #tpu.memory_space<vmem>>, vector<128x16xbf16>
    %cst = arith.constant dense<0.000000e+00> : vector<32x128xf32>
    %2 = tpu.matmul %0, %1, %cst {dimension_numbers = #tpu.dot_dimension_numbers<[1], [1], [0], [0], [0, 0, 1, 0], [], []>} : vector<32x16xbf16>, vector<128x16xbf16>, vector<32x128xf32> -> vector<32x128xf32>
    %c0_3 = arith.constant 0 : index
    %c0_4 = arith.constant 0 : index
    %3 = vector.load %arg3[%c0_3, %c0_4] : memref<32x1xf32, #tpu.memory_space<vmem>>, vector<32x1xf32>
    %4 = vector.broadcast %3 : vector<32x1xf32> to vector<32x128xf32>
    %5 = arith.addf %2, %4 : vector<32x128xf32>
    %cst_5 = arith.constant 0.000000e+00 : f32
    %6 = vector.broadcast %cst_5 : f32 to vector<32x128xf32>
    %7 = arith.maximumf %5, %6 : vector<32x128xf32>
    %c0_6 = arith.constant 0 : index
    %c0_7 = arith.constant 0 : index
    %8 = vector.load %arg4[%c0_6, %c0_7] : memref<2x32xf32, #tpu.memory_space<vmem>>, vector<2x32xf32>
    %cst_8 = arith.constant dense<0.000000e+00> : vector<2x128xf32>
    %9 = tpu.matmul %8, %7, %cst_8 {dimension_numbers = #tpu.dot_dimension_numbers<[1], [0], [0], [1], [0, 0, 1, 1], [], []>} : vector<2x32xf32>, vector<32x128xf32>, vector<2x128xf32> -> vector<2x128xf32>
    %c0_9 = arith.constant 0 : index
    %c0_10 = arith.constant 0 : index
    %10 = vector.load %arg5[%c0_9, %c0_10] : memref<2x1xf32, #tpu.memory_space<vmem>>, vector<2x1xf32>
    %11 = vector.broadcast %10 : vector<2x1xf32> to vector<2x128xf32>
    %12 = arith.addf %9, %11 : vector<2x128xf32>
    %c0_11 = arith.constant 0 : index
    %c0_12 = arith.constant 0 : index
    %13 = vector.load %arg6[%c0_11, %c0_12] : memref<2x128xf32, #tpu.memory_space<vmem>>, vector<2x128xf32>
    tpu.vector_store %arg6[%c0_11, %c0_12], %12 {strides = array<i32>} : memref<2x128xf32, #tpu.memory_space<vmem>>, vector<2x128xf32>,
    return
  }
  func.func @transform_0(%arg0: i32) -> (i32, i32) {
    %c0_i32 = arith.constant 0 : i32
    %c0_i32_0 = arith.constant 0 : i32
    return %arg0, %c0_i32 : i32, i32
  }
  func.func @transform_1(%arg0: i32) -> (i32, i32) {
    %c0_i32 = arith.constant 0 : i32
    %c0_i32_0 = arith.constant 0 : i32
    %c0_i32_1 = arith.constant 0 : i32
    return %c0_i32, %c0_i32_0 : i32, i32
  }
  func.func @transform_2(%arg0: i32) -> (i32, i32) {
    %c0_i32 = arith.constant 0 : i32
    %c0_i32_0 = arith.constant 0 : i32
    %c0_i32_1 = arith.constant 0 : i32
    return %c0_i32, %c0_i32_0 : i32, i32
  }
  func.func @transform_3(%arg0: i32) -> (i32, i32) {
    %c0_i32 = arith.constant 0 : i32
    %c0_i32_0 = arith.constant 0 : i32
    %c0_i32_1 = arith.constant 0 : i32
    return %c0_i32, %c0_i32_0 : i32, i32
  }
  func.func @transform_4(%arg0: i32) -> (i32, i32) {
    %c0_i32 = arith.constant 0 : i32
    %c0_i32_0 = arith.constant 0 : i32
    %c0_i32_1 = arith.constant 0 : i32
    return %c0_i32, %c0_i32_0 : i32, i32
  }
  func.func @transform_5(%arg0: i32) -> (i32, i32) {
    %c0_i32 = arith.constant 0 : i32
    %c0_i32_0 = arith.constant 0 : i32
    return %c0_i32, %arg0 : i32, i32
  }
}

</mosaic_0001>

<bundles_post_ra>
// kernel: time_order_classifier.1
= control target key start
LH: loop header
LB: loop body
LE: loop exit
PB: predicated region body
PF: predicated region fallthrough
CT: control target
= control target key end

     0   :  { %vm116_vm0 = vcmask 130048   ;;  %v410_v3 = vmov 0   ;;  %s523_s0 = inlined_call_operand.vmem [shape: bf16[8,16], index: 0, kind: input, shape index: {}]   ;;  %s524_s1 = inlined_call_operand.vmem [shape: bf16[32,16], index: 1, kind: input, shape index: {}]   ;;  %s525_s2 = inlined_call_operand.vmem [shape: f32[32,1], index: 2, kind: input, shape index: {}]   ;;  %s526_s3 = inlined_call_operand.vmem [shape: f32[2,32], index: 3, kind: input, shape index: {}]   ;;  %s527_s4 = inlined_call_operand.vmem [shape: f32[2,1], index: 4, kind: input, shape index: {}]   ;;  %s528_s5 = inlined_call_operand.hbm [shape: f32[2,8], index: 5, kind: output, shape index: {}]  }
   0x1   :  { %v376_v0 = vld [vmem:[%s523_s0] sm:$0xff]   ;;  %v377_v1 = vld [vmem:[%s523_s0 + $0x8] sm:$0xff]   ;;  %374 = vset.pattern.permute.xlu0 %v410_v3  ;;  %375 = vset.pattern.permute.xlu1 %v410_v3  ;;  %v378_v4 = vld [vmem:[%s523_s0 + $0x10] sm:$0xff]  }
   0x2   :  { %361 = vmatprep.subr.msk.bf16.mxu0 %vm116_vm0, %v376_v0  ;;  %v124_v2 = vsel %vm116_vm0, %v376_v0, 0  ;;  %v127_v5 = vsel %vm116_vm0, %v377_v1, 0  ;;  %v384_v6 = vld [vmem:[%s524_s1] sm:$0xff]   ;;  %v44_v8 = vld [vmem:[%s525_s2 + $0x10] sm:$0xff] }
   0x3   :  { %325 = vmatpush3.bf16.xpose.msra.mxu0 %v124_v2  ;;  %340 = vmatprep.mubr.msk.bf16.mxu0 %vm116_vm0, %v384_v6  ;;  %v42_v7 = vld [vmem:[%s525_s2] sm:$0xff] }
   0x4   :  { %362 = vmatprep.subr.msk.bf16.mxu0 %vm116_vm0, %v377_v1  ;;  %48 = vperm.xlu0 %374, %v42_v7  }
   0xb   :  { %327 = vmatpush3.bf16.xpose.msra.mxu0 %v127_v5 }
   0xc   :  { %10 = vsyncpa [#allocation3], 0  ;;  %363 = vmatprep.subr.msk.bf16.mxu0 %vm116_vm0, %v378_v4  ;;  %v43_v9 = vld [vmem:[%s525_s2 + $0x8] sm:$0xff]  ;;  %58 = vperm.xlu1 %375, %v44_v8   ;;  %v45_v10 = vld [vmem:[%s525_s2 + $0x18] sm:$0xff]  ;;  %v130_v11 = vsel %vm116_vm0, %v378_v4, 0  ;;  %v411_v24 = vmov 0.0|0.0  }
   0xd   :  { %53 = vperm.xlu0 %374, %v43_v9   ;;  %v379_v12 = vld [vmem:[%s523_s0 + $0x18] sm:$0xff]   ;;  %v201_v13 = vld [vmem:[%s527_s4] sm:$0x3]  ;;  %v381_v17 = vld [vmem:[%s523_s0 + $0x28] sm:$0xff]   ;;  %355 = vmatprep.subr.bf16.mxu1 %v411_v24  ;;  %vm412_vm1 = vmmov 0   ;;  %v413_v25 = vmov 0.0  }
   0xe   :  { %v133_v14 = vsel %vm116_vm0, %v379_v12, 0  ;;  %v380_v15 = vld [vmem:[%s523_s0 + $0x20] sm:$0xff]   ;;  %v139_v18 = vsel %vm116_vm0, %v381_v17, 0  ;;  %v382_v19 = vld [vmem:[%s523_s0 + $0x30] sm:$0xff]   ;;  %v383_v21 = vld [vmem:[%s523_s0 + $0x38] sm:$0xff]   ;;  %352 = vmatprep.mubr.msk.f32.mxu1 %vm412_vm1, %v413_v25  ;;  %vm207_vm2 = vcmask 261120  }
   0xf   :  { %v136_v16 = vsel %vm116_vm0, %v380_v15, 0  ;;  %v142_v20 = vsel %vm116_vm0, %v382_v19, 0  ;;  %v145_v22 = vsel %vm116_vm0, %v383_v21, 0  ;;  %v385_v23 = vld [vmem:[%s524_s1 + $0x8] sm:$0xff]   ;;  %v200_v44 = vld [vmem:[%s526_s3] sm:$0x3] }
  0x10   :  { %63 = vperm.xlu1 %375, %v45_v10   ;;  %s414_s21 = smov [#allocation2]  }
  0x11   :  { %204 = vperm.xlu0 %374, %v201_v13   ;;  %s288_s22 = sshll.u32 %s414_s21, 4  ;;  %s289_s22 = int_to_ptr.vmem [resolvable:$true] %s288_s22 }
  0x12   :  { %s386_s23 = scalar_lea.vmem %s289_s22, 32  ;;  %p391_p1 = scmp.lt.s32.totalorder %s289_s22, %s289_s22 }
  0x13   :  { %329 = vmatpush3.bf16.xpose.msra.mxu0 %v130_v11  ;;  %p387_p0 = scmp.ne.s32.totalorder %s289_s22, %s386_s23  ;;  %p392_p2 = scmp.lt.s32.totalorder %s386_s23, %s386_s23 }
  0x14   :  { %364 = vmatprep.subr.msk.bf16.mxu0 %vm116_vm0, %v379_v12 }
  0x15   :  { %p393_p3 = por %p392_p2, %p391_p1 }
  0x17   :  { %p394_p4 = pnand %p393_p3, %p387_p0 }
  0x1b   :  { %331 = vmatpush3.bf16.xpose.msra.mxu0 %v133_v14 }
  0x1c   :  { %365 = vmatprep.subr.msk.bf16.mxu0 %vm116_vm0, %v380_v15 }
  0x23   :  { %333 = vmatpush3.bf16.xpose.msra.mxu0 %v136_v16 }
  0x24   :  { %366 = vmatprep.subr.msk.bf16.mxu0 %vm116_vm0, %v381_v17 }
  0x2b   :  { %335 = vmatpush3.bf16.xpose.msra.mxu0 %v139_v18 }
  0x2c   :  { %367 = vmatprep.subr.msk.bf16.mxu0 %vm116_vm0, %v382_v19 }
  0x33   :  { %337 = vmatpush3.bf16.xpose.msra.mxu0 %v142_v20 }
  0x34   :  { %368 = vmatprep.subr.msk.bf16.mxu0 %vm116_vm0, %v383_v21 }
  0x3b   :  { %339 = vmatpush3.bf16.xpose.msra.mxu0 %v145_v22 }
  0x42   :  { %341 = vmatmul.mubr.msk.bf16.vlgmr.msra.gmra.mrb[0].mxu0 %vm116_vm0, %v385_v23 }
  0x83   :  { %v49_v27 = vpop.permute.xlu0 %48 }
  0x8b   :  { %v59_v26 = vpop.permute.xlu1 %58 }
  0x8c   :  { %v54_v34 = vpop.permute.xlu0 %53 }
  0x8f   :  { %v64_v29 = vpop.permute.xlu1 %63 }
  0x90   :  { %v205_v45 = vpop.permute.xlu0 %204 }
 0x115   :  { %v342_v28 = vpop.f32.mrb[0].mxu0 }
 0x116   :  { %v190_v30 = vadd.f32 %v342_v28, %v59_v26  ;;  %v181_v31 = vpop.f32.mrb[1].mxu0 }
 0x117   :  { %v182_v32 = vadd.f32 %v181_v31, %v49_v27  ;;  %v343_v33 = vpop.f32.mrb[2].mxu0 }
 0x118   :  { %v193_v35 = vadd.f32 %v343_v33, %v64_v29  ;;  %v184_v36 = vpop.f32.mrb[3].mxu0  ;;  %v198_v38 = vmax.f32 %v190_v30, 0.0 }
 0x119   :  { %v185_v37 = vadd.f32 %v184_v36, %v54_v34  ;;  %v196_v40 = vmax.f32 %v182_v32, 0.0 }
 0x11a   :  { %v199_v39 = vmax.f32 %v193_v35, 0.0 }
 0x11b   :  { %v197_v41 = vmax.f32 %v185_v37, 0.0 }
 0x11c   :  { %v359_v42 = vpack.c.bf16 %v199_v39, %v198_v38 }
 0x11d   :  { %v356_v43 = vpack.c.bf16 %v197_v41, %v196_v40 }
 0x11f   :  { %357 = vmatpush3.bf16.msra.mxu1 %v356_v43 }
 0x120   :  { %358 = vmatprep.subr.bf16.mxu1 %v411_v24 }
 0x123   :  { %360 = vmatpush3.bf16.msra.mxu1 %v359_v42 }
 0x126   :  { %353 = vmatmul.mubr.msk.f32.vlgmr.msra.gmra.mrb[0].mxu1 %vm207_vm2, %v200_v44 }
 0x1f9   :  { %v277_v46 = vpop.f32.mrb[0].mxu1 }
 0x1fa   :  { %v278_v47 = vadd.f32 %v277_v46, %v205_v45  ;;  %v354_v48 = vpop.f32.mrb[1].mxu1 }
 0x1fc   :  { %281 = vst [vmem:[#allocation2] sm:$0x3] %v278_v47 }
 0x1fd   :  { %397 = shalt.err (!%p394_p4)
}
 0x1fe   :  { %s398_s3 = scalar_lea.hbm %s528_s5, 32 }
 0x1ff   :  { %p399_p5 = scmp.ne.s32.totalorder %s528_s5, %s398_s3  ;;  %p402_p6 = scmp.lt.u32.totalorder %s398_s3, %s528_s5 }
 0x201   :  { %p404_p7 = pnand %p402_p6, %p399_p5 }
 0x203   :  { %407 = shalt.err (!%p404_p7)
}
 0x204   :  { %291 = dma.vmem_to_hbm [thread:$0]  %s289_s22, 32, %s528_s5, [#allocation3]  }
 0x205   :  { %408 = dma.done.wait [#allocation3], 32  }
 0x206   :  { %409 = vsyncadd [#allocation3], 4294967264 }
 0x207   :  { %295 = vsyncpa [#allocation3], 1 }

</bundles_post_ra>
